<compile_context>
chip_gen: v7x
topology: tpu7x:2x2x1
jax: 0.10.0
libtpu: 0.0.40
codegen_flags: <defaults>
</compile_context>

<pallas_src>
import jax
import jax.numpy as jnp
from jax.experimental import pallas as pl
from jax.experimental.pallas import tpu as pltpu


D_IN, D_HID, D_OUT = 20, 256, 10


def mlp_kernel(x_ref, w1_ref, b1_ref, w2_ref, b2_ref, o_ref):
    # hidden = relu(x @ W1 + b1)  (MXU matmul, f32 accumulate, f32 bias/ReLU)
    h = jnp.dot(x_ref[...], w1_ref[...], preferred_element_type=jnp.float32)
    h = jnp.maximum(h + b1_ref[...], 0.0)
    # out = hidden @ W2 + b2 ; hidden stays an in-kernel VMEM/vreg temporary.
    y = jnp.dot(h.astype(w2_ref.dtype), w2_ref[...],
                preferred_element_type=jnp.float32)
    o_ref[...] = (y + b2_ref[...]).astype(o_ref.dtype)


def _round_up(x, m):
    return (x + m - 1) // m * m


def mlp_forward(x, w1, b1, w2, b2, *, batch_tile=2048, io_dtype=None,
                out_dtype=jnp.float32):
    """Fused two-layer MLP forward.

    io_dtype: optional storage dtype (e.g. jnp.bfloat16) for x / W1 / W2 to
              halve HBM traffic; accumulation stays f32 in-kernel.
    """
    B, d_in = x.shape
    d_hid = w1.shape[1]
    d_out = w2.shape[1]
    assert w1.shape == (d_in, d_hid) and w2.shape == (d_hid, d_out)

    if io_dtype is not None:
        x = x.astype(io_dtype)
        w1 = w1.astype(io_dtype)
        w2 = w2.astype(io_dtype)

    # Biases kept 2D (1, d) and f32 (bias-add / ReLU run in f32 on the VPU).
    b1 = jnp.reshape(b1, (1, d_hid)).astype(jnp.float32)
    b2 = jnp.reshape(b2, (1, d_out)).astype(jnp.float32)

    out_shape = jax.ShapeDtypeStruct((B, d_out), out_dtype)
    cost = pl.CostEstimate(
        flops=2 * B * (d_in * d_hid + d_hid * d_out),
        transcendentals=0,
        bytes_accessed=(x.size * x.dtype.itemsize
                        + w1.size * w1.dtype.itemsize
                        + w2.size * w2.dtype.itemsize
                        + (b1.size + b2.size) * 4
                        + B * d_out * jnp.dtype(out_dtype).itemsize),
    )

    if B <= 256:
        # Single-shot path: no grid, no pipeline machinery; every operand is
        # one full VMEM-resident block (total footprint is tens of KB).
        return pl.pallas_call(
            mlp_kernel,
            out_shape=out_shape,
            cost_estimate=cost,
        )(x, w1, b1, w2, b2)

    # Tiled path: pipelined sweep over the batch.  Tile is capped so the grid
    # always has >= 2 steps (lights up both TensorCores on v7x via the
    # "parallel" semantic); weights/biases stay VMEM-resident across steps.
    tb = min(batch_tile, _round_up((B + 1) // 2, 8))
    grid = (pl.cdiv(B, tb),)   # last tile may be partial; Pallas masks it.

    return pl.pallas_call(
        mlp_kernel,
        out_shape=out_shape,
        grid=grid,
        in_specs=[
            pl.BlockSpec((tb, d_in), lambda i: (i, 0)),     # x: batch-tiled
            pl.BlockSpec((d_in, d_hid), lambda i: (0, 0)),  # W1: resident
            pl.BlockSpec((1, d_hid), lambda i: (0, 0)),     # b1: resident
            pl.BlockSpec((d_hid, d_out), lambda i: (0, 0)), # W2: resident
            pl.BlockSpec((1, d_out), lambda i: (0, 0)),     # b2: resident
        ],
        out_specs=pl.BlockSpec((tb, d_out), lambda i: (i, 0)),
        compiler_params=pltpu.CompilerParams(
            dimension_semantics=("parallel",)),
        cost_estimate=cost,
    )(x, w1, b1, w2, b2)


def init_params(key, d_in=D_IN, d_hid=D_HID, d_out=D_OUT):
    """Deterministic init mimicking nn.Linear: U(-1/sqrt(fan_in), 1/sqrt(fan_in))."""
    k1, k2, k3, k4 = jax.random.split(key, 4)
    bound1 = 1.0 / jnp.sqrt(jnp.float32(d_in))
    bound2 = 1.0 / jnp.sqrt(jnp.float32(d_hid))
    # Stored as [in, out] (transpose of PyTorch's [out, in]) so the kernel does x @ W.
    w1 = jax.random.uniform(k1, (d_in, d_hid), jnp.float32, -bound1, bound1)
    b1 = jax.random.uniform(k2, (d_hid,), jnp.float32, -bound1, bound1)
    w2 = jax.random.uniform(k3, (d_hid, d_out), jnp.float32, -bound2, bound2)
    b2 = jax.random.uniform(k4, (d_out,), jnp.float32, -bound2, bound2)
    return w1, b1, w2, b2


if __name__ == "__main__":
    key = jax.random.PRNGKey(0)
    kx, kp, kx2 = jax.random.split(key, 3)
    w1, b1, w2, b2 = init_params(kp)

    # Small batch matching the PyTorch spec: single-shot (no grid) f32 path.
    B = 2
    x = jax.random.normal(kx, (B, D_IN), jnp.float32)
    out = jax.block_until_ready(mlp_forward(x, w1, b1, w2, b2))
    ref = jnp.maximum(x @ w1 + b1, 0.0) @ w2 + b2
    assert out.shape == (B, D_OUT)
    assert jnp.allclose(out, ref, atol=1e-5, rtol=1e-5)

    # Larger, non-divisible batch: tiled path (2 grid steps, masked tail tile)
    # with bf16 storage for x / weights (f32 accumulate + bias/ReLU in-kernel).
    B2 = 1000
    x2 = jax.random.normal(kx2, (B2, D_IN), jnp.float32)
    out2 = jax.block_until_ready(
        mlp_forward(x2, w1, b1, w2, b2, io_dtype=jnp.bfloat16))
    xb = x2.astype(jnp.bfloat16).astype(jnp.float32)
    w1b = w1.astype(jnp.bfloat16).astype(jnp.float32)
    w2b = w2.astype(jnp.bfloat16).astype(jnp.float32)
    ref2 = jnp.maximum(xb @ w1b + b1, 0.0) @ w2b + b2
    assert out2.shape == (B2, D_OUT)
    assert jnp.allclose(out2, ref2, atol=2e-2, rtol=2e-2)

    print("KERNEL_OK")
</pallas_src>

<mosaic_0001>
module attributes {stable_mosaic.version = 11 : i64} {
  func.func @mlp_kernel(%arg0: memref<2x20xf32, #tpu.memory_space<vmem>>, %arg1: memref<20x256xf32, #tpu.memory_space<vmem>>, %arg2: memref<1x256xf32, #tpu.memory_space<vmem>>, %arg3: memref<256x10xf32, #tpu.memory_space<vmem>>, %arg4: memref<1x10xf32, #tpu.memory_space<vmem>>, %arg5: memref<2x10xf32, #tpu.memory_space<vmem>>) attributes {dimension_semantics = [], scalar_prefetch = 0 : i64, scratch_operands = 0 : i64, tpu.core_type = #tpu.core_type<tc>} {
    %c0 = arith.constant 0 : index
    %c0_0 = arith.constant 0 : index
    %0 = vector.load %arg0[%c0, %c0_0] : memref<2x20xf32, #tpu.memory_space<vmem>>, vector<2x20xf32>
    %c0_1 = arith.constant 0 : index
    %c0_2 = arith.constant 0 : index
    %1 = vector.load %arg1[%c0_1, %c0_2] : memref<20x256xf32, #tpu.memory_space<vmem>>, vector<20x256xf32>
    %cst = arith.constant dense<0.000000e+00> : vector<2x256xf32>
    %2 = tpu.matmul %0, %1, %cst {dimension_numbers = #tpu.dot_dimension_numbers<[1], [0], [0], [1], [0, 0, 1, 1], [], []>} : vector<2x20xf32>, vector<20x256xf32>, vector<2x256xf32> -> vector<2x256xf32>
    %c0_3 = arith.constant 0 : index
    %c0_4 = arith.constant 0 : index
    %3 = vector.load %arg2[%c0_3, %c0_4] : memref<1x256xf32, #tpu.memory_space<vmem>>, vector<1x256xf32>
    %4 = vector.broadcast %3 : vector<1x256xf32> to vector<2x256xf32>
    %5 = arith.addf %2, %4 : vector<2x256xf32>
    %cst_5 = arith.constant 0.000000e+00 : f32
    %6 = vector.broadcast %cst_5 : f32 to vector<2x256xf32>
    %7 = arith.maximumf %5, %6 : vector<2x256xf32>
    %c0_6 = arith.constant 0 : index
    %c0_7 = arith.constant 0 : index
    %8 = vector.load %arg3[%c0_6, %c0_7] : memref<256x10xf32, #tpu.memory_space<vmem>>, vector<256x10xf32>
    %cst_8 = arith.constant dense<0.000000e+00> : vector<2x10xf32>
    %9 = tpu.matmul %7, %8, %cst_8 {dimension_numbers = #tpu.dot_dimension_numbers<[1], [0], [0], [1], [0, 0, 1, 1], [], []>} : vector<2x256xf32>, vector<256x10xf32>, vector<2x10xf32> -> vector<2x10xf32>
    %c0_9 = arith.constant 0 : index
    %c0_10 = arith.constant 0 : index
    %10 = vector.load %arg4[%c0_9, %c0_10] : memref<1x10xf32, #tpu.memory_space<vmem>>, vector<1x10xf32>
    %11 = vector.broadcast %10 : vector<1x10xf32> to vector<2x10xf32>
    %12 = arith.addf %9, %11 : vector<2x10xf32>
    %c0_11 = arith.constant 0 : index
    %c0_12 = arith.constant 0 : index
    %13 = vector.load %arg5[%c0_11, %c0_12] : memref<2x10xf32, #tpu.memory_space<vmem>>, vector<2x10xf32>
    tpu.vector_store %arg5[%c0_11, %c0_12], %12 {strides = array<i32>} : memref<2x10xf32, #tpu.memory_space<vmem>>, vector<2x10xf32>,
    return
  }
}

</mosaic_0001>

<bundles_post_ra>
// kernel: tpu_custom_call.1
= control target key start
LH: loop header
LB: loop body
LE: loop exit
PB: predicated region body
PF: predicated region fallthrough
CT: control target
= control target key end

     0   :  { %v350_v5 = vmov 0.0   ;;  %vm44_vm0 = vcmask 1043456   ;;  %vm40_vm1 = vcmask 162816   ;;  %s519_s0 = inlined_call_operand.vmem [shape: f32[2,20], index: 0, kind: input, shape index: {}]   ;;  %s520_s1 = inlined_call_operand.vmem [shape: f32[20,256], index: 1, kind: input, shape index: {}]   ;;  %s521_s2 = inlined_call_operand.vmem [shape: f32[1,256], index: 2, kind: input, shape index: {}]   ;;  %s522_s3 = inlined_call_operand.vmem [shape: f32[256,10], index: 3, kind: input, shape index: {}]   ;;  %s523_s4 = inlined_call_operand.vmem [shape: f32[1,10], index: 4, kind: input, shape index: {}]   ;;  %s524_s5 = inlined_call_operand.hbm [shape: f32[2,10], index: 5, kind: output, shape index: {}]  }
   0x1   :  { %v23_v0 = vld [vmem:[%s520_s1 + $0x8] sm:$0xff]  ;;  %v25_v1 = vld [vmem:[%s520_s1 + $0x18] sm:$0xff]  ;;  %v22_v2 = vld [vmem:[%s520_s1] sm:$0xff]  ;;  %115 = vmatprep.mubr.f32.mxu0 %v350_v5 }
   0x2   :  { %v288_v3 = vpack.c.bf16 %v25_v1, %v23_v0  ;;  %v24_v4 = vld [vmem:[%s520_s1 + $0x10] sm:$0xff]  ;;  %v27_v7 = vld [vmem:[%s520_s1 + $0x28] sm:$0xf]  ;;  %v140_v8 = vld [vmem:[%s522_s3 + $0x80] sm:$0xff] }
   0x3   :  { %v290_v6 = vpack.c.bf16 %v24_v4, %v22_v2  ;;  %v141_v9 = vld [vmem:[%s522_s3 + $0x88] sm:$0xff]  ;;  %v124_v11 = vld [vmem:[%s522_s3] sm:$0xff]  ;;  %v142_v13 = vld [vmem:[%s522_s3 + $0x90] sm:$0xff] }
   0x4   :  { %289 = vmatprep.subr.bf16.mxu0 %v288_v3  ;;  %v292_v10 = vpack.c.bf16 %v141_v9, %v140_v8  ;;  %v125_v12 = vld [vmem:[%s522_s3 + $0x8] sm:$0xff]  ;;  %v143_v15 = vld [vmem:[%s522_s3 + $0x98] sm:$0xff]  ;;  %v126_v16 = vld [vmem:[%s522_s3 + $0x10] sm:$0xff] }
   0x5   :  { %291 = vmatpush1.bf16.msra.mxu0 %v290_v6  ;;  %v294_v14 = vpack.c.bf16 %v125_v12, %v124_v11  ;;  %v127_v17 = vld [vmem:[%s522_s3 + $0x18] sm:$0xff]  ;;  %v26_v18 = vld [vmem:[%s520_s1 + $0x20] sm:$0xf]  ;;  %v296_v19 = vpack.c.bf16 %v143_v15, %v142_v13  ;;  %v145_v21 = vld [vmem:[%s522_s3 + $0xa8] sm:$0xff] }
   0x6   :  { %249 = vmatprep.subr.msk.mxu0 %vm44_vm0, %v27_v7  ;;  %293 = vmatprep.subr.bf16.mxu1 %v292_v10  ;;  %v144_v20 = vld [vmem:[%s522_s3 + $0xa0] sm:$0xff]  ;;  %v298_v23 = vpack.c.bf16 %v127_v17, %v126_v16  ;;  %v129_v26 = vld [vmem:[%s522_s3 + $0x28] sm:$0xff]  ;;  %v146_v27 = vld [vmem:[%s522_s3 + $0xb0] sm:$0xff] }
   0x7   :  { %v21_v22 = vld [vmem:[%s519_s0] sm:$0x3]  ;;  %295 = vmatpush3.bf16.msra.mxu1 %v294_v14  ;;  %v300_v24 = vpack.c.bf16 %v145_v21, %v144_v20  ;;  %v147_v28 = vld [vmem:[%s522_s3 + $0xb8] sm:$0xff]  ;;  %v130_v31 = vld [vmem:[%s522_s3 + $0x30] sm:$0xff] }
   0x8   :  { %297 = vmatprep.subr.bf16.mxu1 %v296_v19  ;;  %v128_v25 = vld [vmem:[%s522_s3 + $0x20] sm:$0xff]  ;;  %v304_v30 = vpack.c.bf16 %v147_v28, %v146_v27  ;;  %v131_v32 = vld [vmem:[%s522_s3 + $0x38] sm:$0xff] }
   0x9   :  { %250 = vmatpush1.msk.msra.mxu0 %vm44_vm0, %v26_v18  ;;  %v302_v29 = vpack.c.bf16 %v129_v26, %v128_v25 }
   0xa   :  { %251 = vmatmul.mubr.msk.f32.vlgmr.msra.gmra.mrb[0].mxu0 %vm40_vm1, %v21_v22 }
   0xb   :  { %299 = vmatpush3.bf16.msra.mxu1 %v298_v23 }
   0xc   :  { %301 = vmatprep.subr.bf16.mxu1 %v300_v24 }
   0xd   :  { %10 = vsyncpa [#allocation3], 0  ;;  %v148_v33 = vld [vmem:[%s522_s3 + $0xc0] sm:$0xff]  ;;  %v149_v34 = vld [vmem:[%s522_s3 + $0xc8] sm:$0xff]  ;;  %v306_v35 = vpack.c.bf16 %v131_v32, %v130_v31  ;;  %v30_v58 = vlaneseq  ;;  %s351_s20 = smov [#allocation2]   ;;  %vm233_vm2 = vcmask 74752  }
   0xe   :  { %v308_v36 = vpack.c.bf16 %v149_v34, %v148_v33  ;;  %v132_v37 = vld [vmem:[%s522_s3 + $0x40] sm:$0xff]  ;;  %v133_v38 = vld [vmem:[%s522_s3 + $0x48] sm:$0xff]  ;;  %v150_v39 = vld [vmem:[%s522_s3 + $0xd0] sm:$0xff]  ;;  %s241_s21 = sshll.u32 %s351_s20, 4  ;;  %s242_s21 = int_to_ptr.vmem [resolvable:$true] %s241_s21 }
   0xf   :  { %303 = vmatpush3.bf16.msra.mxu1 %v302_v29  ;;  %v151_v40 = vld [vmem:[%s522_s3 + $0xd8] sm:$0xff]  ;;  %v310_v41 = vpack.c.bf16 %v133_v38, %v132_v37  ;;  %v134_v43 = vld [vmem:[%s522_s3 + $0x50] sm:$0xff]  ;;  %v152_v45 = vld [vmem:[%s522_s3 + $0xe0] sm:$0xff]  ;;  %v31_v59 = vshrl.u32 %v30_v58, 7  ;;  %p331_p1 = scmp.lt.s32.totalorder %s242_s21, %s242_s21 }
  0x10   :  { %305 = vmatprep.subr.bf16.mxu1 %v304_v30  ;;  %v312_v42 = vpack.c.bf16 %v151_v40, %v150_v39  ;;  %v135_v44 = vld [vmem:[%s522_s3 + $0x58] sm:$0xff]  ;;  %v153_v46 = vld [vmem:[%s522_s3 + $0xe8] sm:$0xff]  ;;  %v136_v49 = vld [vmem:[%s522_s3 + $0x60] sm:$0xff] }
  0x11   :  { %v314_v47 = vpack.c.bf16 %v135_v44, %v134_v43  ;;  %v316_v48 = vpack.c.bf16 %v153_v46, %v152_v45  ;;  %v137_v50 = vld [vmem:[%s522_s3 + $0x68] sm:$0xff]  ;;  %v154_v52 = vld [vmem:[%s522_s3 + $0xf0] sm:$0xff]  ;;  %v155_v53 = vld [vmem:[%s522_s3 + $0xf8] sm:$0xff]  ;;  %v32_v60 = vsub.s32 0, %v31_v59  ;;  %v36_v62 = vsub.s32 1, %v31_v59 }
  0x12   :  { %v318_v51 = vpack.c.bf16 %v137_v50, %v136_v49  ;;  %v320_v54 = vpack.c.bf16 %v155_v53, %v154_v52  ;;  %v138_v55 = vld [vmem:[%s522_s3 + $0x70] sm:$0xff]  ;;  %v139_v56 = vld [vmem:[%s522_s3 + $0x78] sm:$0xff]  ;;  %v28_v61 = vld [vmem:[%s521_s2] sm:$0x3]  ;;  %s326_s2 = scalar_lea.vmem %s242_s21, 32 }
  0x13   :  { %307 = vmatpush3.bf16.msra.mxu1 %v306_v35  ;;  %v322_v57 = vpack.c.bf16 %v139_v56, %v138_v55  ;;  %v33_v63 = vrot.slane %v28_v61, %v32_v60  ;;  %v37_v0 = vrot.slane %v28_v61, %v36_v62  ;;  %v252_v8 = vld [vmem:[%s523_s4] ss:$0 sm:$0xff]  ;;  %p327_p0 = scmp.ne.s32.totalorder %s242_s21, %s326_s2  ;;  %p332_p2 = scmp.lt.s32.totalorder %s326_s2, %s326_s2 }
  0x14   :  { %309 = vmatprep.subr.bf16.mxu1 %v308_v36 }
  0x15   :  { %p333_p3 = por %p332_p2, %p331_p1 }
  0x17   :  { %311 = vmatpush3.bf16.msra.mxu1 %v310_v41  ;;  %p334_p4 = pnand %p333_p3, %p327_p0 }
  0x18   :  { %313 = vmatprep.subr.bf16.mxu1 %v312_v42 }
  0x1b   :  { %315 = vmatpush3.bf16.msra.mxu1 %v314_v47 }
  0x1c   :  { %317 = vmatprep.subr.bf16.mxu1 %v316_v48 }
  0x1f   :  { %319 = vmatpush3.bf16.msra.mxu1 %v318_v51 }
  0x20   :  { %321 = vmatprep.subr.bf16.mxu1 %v320_v54 }
  0x23   :  { %323 = vmatpush3.bf16.msra.mxu1 %v322_v57 }
  0xdd   :  { %v117_v1 = vpop.f32.mrb[0].mxu0 }
  0xde   :  { %v118_v2 = vadd.f32 %v117_v1, %v33_v63  ;;  %v119_v3 = vpop.f32.mrb[1].mxu0 }
  0xdf   :  { %v120_v4 = vadd.f32 %v119_v3, %v37_v0 }
  0xe0   :  { %v122_v6 = vmax.f32 %v118_v2, 0.0 }
  0xe1   :  { %v123_v5 = vmax.f32 %v120_v4, 0.0 }
  0xe3   :  { %227 = vmatprep.mubr.f32.mxu1 %v123_v5 }
  0xe4   :  { %228 = vmatmul.mubr.f32.vlgmr.msra.gmra.mrb[0].mxu1 %v122_v6 }
 0x1b7   :  { %v285_v7 = vpop.f32.mrb[0].mxu1 }
 0x1b8   :  { %v286_v9 = vpop.f32.mrb[1].mxu1 }
 0x1b9   :  { %v287_v10 = vadd.f32 %v286_v9, %v285_v7 }
 0x1bb   :  { %v230_v11 = vadd.f32 %v287_v10, %v252_v8 }
 0x1bd   :  { %234 = vst.msk [vmem:[#allocation2] sm:$0x3] %vm233_vm2, %v230_v11 }
 0x1be   :  { %337 = shalt.err (!%p334_p4)
}
 0x1bf   :  { %s338_s24 = scalar_lea.hbm %s524_s5, 32 }
 0x1c0   :  { %p339_p5 = scmp.ne.s32.totalorder %s524_s5, %s338_s24  ;;  %p342_p6 = scmp.lt.u32.totalorder %s338_s24, %s524_s5 }
 0x1c2   :  { %p344_p7 = pnand %p342_p6, %p339_p5 }
 0x1c4   :  { %347 = shalt.err (!%p344_p7)
}
 0x1c5   :  { %244 = dma.vmem_to_hbm [thread:$0]  %s242_s21, 32, %s524_s5, [#allocation3]  }
 0x1c6   :  { %348 = dma.done.wait [#allocation3], 32  }
 0x1c7   :  { %349 = vsyncadd [#allocation3], 4294967264 }
 0x1c8   :  { %248 = vsyncpa [#allocation3], 1 }

</bundles_post_ra>
